<compile_context>
chip_gen: v6e
topology: v6e:2x2x1
jax: 0.10.0
libtpu: 0.0.40
codegen_flags: <defaults>
</compile_context>

<pallas_src>
import jax
import jax.numpy as jnp
from jax import lax
from jax.experimental import pallas as pl
from jax.experimental.pallas import tpu as pltpu


def _keep_mask(shape, seed_u32):
    """Bernoulli(keep=0.5) mask from a short counter-based integer hash.

    `shape` is the (din, 1) column layout: only the leading (sublane) index
    distinguishes elements, so only one iota axis is hashed. Two vector u32
    multiplies total; high bit -> keep with prob 0.5.
    """
    idx = lax.broadcasted_iota(jnp.uint32, shape, 0)
    v = seed_u32 * jnp.uint32(0x9E3779B9) + idx * jnp.uint32(0x85EBCA6B)
    v = v ^ (v >> 16)
    v = v * jnp.uint32(0x7FEB352D)
    v = v ^ (v >> 15)
    return v < jnp.uint32(0x80000000)


def _mlp_head_kernel(x_ref, wt_ref, b_ref, seed_ref, o_ref):
    """x_ref: (din, 1) column, wt_ref: (din, dout) = W1^T, b_ref: (1, dout),
    seed_ref: (1,) int32 in SMEM, o_ref: (1, dout)."""
    x = x_ref[...]                                   # (din, 1)

    # relu (whole-tile VPU)
    f = jnp.maximum(x, 0.0)

    # dropout(p=0.5, training=True): keep-mask from hash bits, scale by 1/(1-p)=2
    keep = _keep_mask(f.shape, seed_ref[0].astype(jnp.uint32))
    xd = jnp.where(keep, f * 2.0, 0.0)               # (din, 1)

    # linear1: y[0, j] = sum_k xd[k] * W^T[k, j] + b[j]
    #   one lane-broadcast multiply (VPU) + one sublane reduce (XLU slot)
    prod = xd * wt_ref[...]                          # (din, dout)
    y = jnp.sum(prod, axis=0, keepdims=True)         # (1, dout)

    # dropout(p=0.5, training=False): identity
    o_ref[...] = (y + b_ref[...]).astype(o_ref.dtype)


def model_forward(x, w1_t, b1, seed):
    """x: (1, din) f32; w1_t: (din, dout) f32 (W1 transposed, prepared once at
    init); b1: (1, dout) f32 (prepared once at init); seed: (1,) int32."""
    n, din = x.shape
    dout = w1_t.shape[1]
    assert n == 1, "module spec is a single row (1, 3)"
    # (1, din) -> (din, 1): pure metadata reshape for contiguous data, no copy.
    x_col = x.reshape(din, 1)
    return pl.pallas_call(
        _mlp_head_kernel,
        out_shape=jax.ShapeDtypeStruct((n, dout), jnp.float32),
        in_specs=[
            pl.BlockSpec(memory_space=pltpu.MemorySpace.VMEM),   # x column
            pl.BlockSpec(memory_space=pltpu.MemorySpace.VMEM),   # W1^T (const)
            pl.BlockSpec(memory_space=pltpu.MemorySpace.VMEM),   # b1   (const)
            pl.BlockSpec(memory_space=pltpu.MemorySpace.SMEM),   # seed scalar
        ],
        out_specs=pl.BlockSpec(memory_space=pltpu.MemorySpace.VMEM),
    )(x_col, w1_t, b1, seed)


def _reference(x, w1_t, b1, seed):
    """Pure-JAX reference using the identical mask construction."""
    din = x.shape[1]
    f = jnp.maximum(x, 0.0)
    keep = _keep_mask((din, 1), seed[0].astype(jnp.uint32)).reshape(1, din)
    xd = jnp.where(keep, f * 2.0, 0.0)
    return xd @ w1_t + b1


if __name__ == "__main__":
    root = jax.random.PRNGKey(0)
    kx, kw, kb = jax.random.split(root, 3)

    # ---- one-time init (hoisted out of the per-call path) -------------------
    # linear1 params, torch-style init U(-1/sqrt(fan_in), 1/sqrt(fan_in)).
    # linear2..6 are dead code w.r.t. the module's return value and are omitted.
    bound = 1.0 / jnp.sqrt(3.0)
    w1_t = jax.random.uniform(kw, (3, 3), jnp.float32, -bound, bound)  # W1^T
    b1 = jax.random.uniform(kb, (1, 3), jnp.float32, -bound, bound)
    w1_t, b1 = jax.block_until_ready((w1_t, b1))

    # ---- per-call inputs -----------------------------------------------------
    # Input matching the module: x ~ N(0, 1), shape (1, 3).
    x = jax.random.normal(kx, (1, 3), jnp.float32)
    # TODO(synk): caller must advance `seed` every step; the hash is not
    # bit-compatible with PyTorch's dropout RNG (only distributionally 0.5).
    seed = jnp.array([0], dtype=jnp.int32)

    out = jax.block_until_ready(model_forward(x, w1_t, b1, seed))
    ref = jax.block_until_ready(_reference(x, w1_t, b1, seed))

    assert out.shape == (1, 3) and out.dtype == jnp.float32
    assert jnp.allclose(out, ref, atol=1e-5, rtol=1e-5)
    print("KERNEL_OK")
</pallas_src>

<mosaic_0001>
module attributes {stable_mosaic.version = 11 : i64} {
  func.func @_mlp_head_kernel(%arg0: memref<3x1xf32, #tpu.memory_space<vmem>>, %arg1: memref<3x3xf32, #tpu.memory_space<vmem>>, %arg2: memref<1x3xf32, #tpu.memory_space<vmem>>, %arg3: memref<1xi32, #tpu.memory_space<smem>>, %arg4: memref<1x3xf32, #tpu.memory_space<vmem>>) attributes {dimension_semantics = [], scalar_prefetch = 0 : i64, scratch_operands = 0 : i64, tpu.core_type = #tpu.core_type<tc>} {
    %c0 = arith.constant 0 : index
    %c0_0 = arith.constant 0 : index
    %0 = vector.load %arg0[%c0, %c0_0] : memref<3x1xf32, #tpu.memory_space<vmem>>, vector<3x1xf32>
    %cst = arith.constant 0.000000e+00 : f32
    %1 = vector.broadcast %cst : f32 to vector<3x1xf32>
    %2 = arith.maximumf %0, %1 : vector<3x1xf32>
    %c0_1 = arith.constant 0 : index
    %3 = memref.load %arg3[%c0_1] : memref<1xi32, #tpu.memory_space<smem>>
    %4 = tpu.iota {dimensions = array<i32: 0>} : vector<3x1xi32>
    %c-1640531527_i32 = arith.constant -1640531527 : i32
    %5 = arith.muli %3, %c-1640531527_i32 : i32
    %c-2048144789_i32 = arith.constant -2048144789 : i32
    %6 = vector.broadcast %c-2048144789_i32 : i32 to vector<3x1xi32>
    %7 = arith.muli %4, %6 : vector<3x1xi32>
    %8 = vector.broadcast %5 : i32 to vector<3x1xi32>
    %9 = arith.addi %8, %7 : vector<3x1xi32>
    %c16_i32 = arith.constant 16 : i32
    %10 = vector.broadcast %c16_i32 : i32 to vector<3x1xi32>
    %11 = arith.shrui %9, %10 : vector<3x1xi32>
    %12 = arith.xori %9, %11 : vector<3x1xi32>
    %c2146121005_i32 = arith.constant 2146121005 : i32
    %13 = vector.broadcast %c2146121005_i32 : i32 to vector<3x1xi32>
    %14 = arith.muli %12, %13 : vector<3x1xi32>
    %c15_i32 = arith.constant 15 : i32
    %15 = vector.broadcast %c15_i32 : i32 to vector<3x1xi32>
    %16 = arith.shrui %14, %15 : vector<3x1xi32>
    %17 = arith.xori %14, %16 : vector<3x1xi32>
    %c-2147483648_i32 = arith.constant -2147483648 : i32
    %18 = vector.broadcast %c-2147483648_i32 : i32 to vector<3x1xi32>
    %19 = arith.cmpi ult, %17, %18 : vector<3x1xi32>
    %cst_2 = arith.constant 2.000000e+00 : f32
    %20 = vector.broadcast %cst_2 : f32 to vector<3x1xf32>
    %21 = arith.mulf %2, %20 : vector<3x1xf32>
    %cst_3 = arith.constant 0.000000e+00 : f32
    %22 = vector.broadcast %cst_3 : f32 to vector<3x1xf32>
    %23 = arith.select %19, %21, %22 : vector<3x1xi1>, vector<3x1xf32>
    %c0_4 = arith.constant 0 : index
    %c0_5 = arith.constant 0 : index
    %24 = vector.load %arg1[%c0_4, %c0_5] : memref<3x3xf32, #tpu.memory_space<vmem>>, vector<3x3xf32>
    %25 = vector.broadcast %23 : vector<3x1xf32> to vector<3x3xf32>
    %26 = arith.mulf %25, %24 : vector<3x3xf32>
    %cst_6 = arith.constant dense<0.000000e+00> : vector<3xf32>
    %27 = vector.multi_reduction <add>, %26, %cst_6 [0] : vector<3x3xf32> to vector<3xf32>
    %28 = vector.shape_cast %27 : vector<3xf32> to vector<1x3xf32>
    %c0_7 = arith.constant 0 : index
    %c0_8 = arith.constant 0 : index
    %29 = vector.load %arg2[%c0_7, %c0_8] : memref<1x3xf32, #tpu.memory_space<vmem>>, vector<1x3xf32>
    %30 = arith.addf %28, %29 : vector<1x3xf32>
    %c0_9 = arith.constant 0 : index
    %c0_10 = arith.constant 0 : index
    %31 = vector.load %arg4[%c0_9, %c0_10] : memref<1x3xf32, #tpu.memory_space<vmem>>, vector<1x3xf32>
    tpu.vector_store %arg4[%c0_9, %c0_10], %30 {strides = array<i32>} : memref<1x3xf32, #tpu.memory_space<vmem>>, vector<1x3xf32>,
    return
  }
}

</mosaic_0001>

<bundles_post_ra>
// kernel: tpu_custom_call.1
= control target key start
LH: loop header
LB: loop body
LE: loop exit
PB: predicated region body
PF: predicated region fallthrough
CT: control target
= control target key end

     0   :  { %v22_v0 = vlaneseq  ;;  %v94_v1 = vmov 0   ;;  %s136_s0 = inlined_call_operand.vmem [shape: f32[3,1], index: 0, kind: input, shape index: {}]   ;;  %s137_s1 = inlined_call_operand.vmem [shape: f32[3,3], index: 1, kind: input, shape index: {}]   ;;  %s138_s2 = inlined_call_operand.vmem [shape: f32[1,3], index: 2, kind: input, shape index: {}]   ;;  %s139_s3 = inlined_call_operand.<no memory space> [shape: s32[1], index: 3, kind: input, shape index: {}]   ;;  %s140_s4 = inlined_call_operand.hbm [shape: f32[1,3], index: 4, kind: output, shape index: {}]  }
   0x1   :  { %s24_s17 = smul.u32 2654435769, %s139_s3  ;;  %71 = vset.pattern.permute.xlu0 %v94_v1 }
   0x2   :  { %10 = vsyncpa [#allocation4], 0  ;;  %v23_v2 = vshrl.u32 %v22_v0, 7  ;;  %v19_v6 = vld [vmem:[%s136_s0] sm:$0x7]  ;;  %vm43_vm1 = vcmask 18432  }
   0x3   :  { %v26_v3 = vstv %s24_s17  ;;  %v20_v9 = vmax.f32 %v19_v6, 0.0  ;;  %v36_v15 = vld [vmem:[%s137_s1] sm:$0x7]  ;;  %s95_s22 = smov [#allocation3]   ;;  %vm53_vm2 = vcmask 16384  }
   0x4   :  { %v25_v4 = vmul.u32 2246822507, %v23_v2  ;;  %v51_v24 = vld [vmem:[%s138_s2] sm:$0x1]  ;;  %s61_s23 = sshll.u32 %s95_s22, 4  ;;  %s62_s23 = int_to_ptr.vmem [resolvable:$true] %s61_s23 }
   0x5   :  { %v34_v12 = vmul.f32 2.0, %v20_v9  ;;  %s72_s1 = scalar_lea.vmem %s62_s23, 16  ;;  %s76_s24 = scalar_lea.vmem %s62_s23, 32 }
   0x6   :  { %v27_v5 = vadd.s32 %v26_v3, %v25_v4  ;;  %p73_p0 = scmp.ne.s32.totalorder %s62_s23, %s72_s1  ;;  %p77_p1 = scmp.lt.s32.totalorder %s62_s23, %s62_s23 }
   0x7   :  { %p78_p2 = scmp.lt.s32.totalorder %s76_s24, %s72_s1 }
   0x8   :  { %v28_v7 = vshrl.u32 %v27_v5, 16 }
   0x9   :  { %p79_p3 = por %p78_p2, %p77_p1 }
   0xa   :  { %v29_v8 = vxor.u32 %v28_v7, %v27_v5 }
   0xb   :  { %p80_p4 = pnand %p79_p3, %p73_p0 }
   0xc   :  { %v30_v10 = vmul.u32 2146121005, %v29_v8 }
   0xe   :  { %v31_v11 = vshrl.u32 %v30_v10, 15 }
  0x10   :  { %v32_v13 = vxor.u32 %v31_v11, %v30_v10 }
  0x12   :  { %vm33_vm0 = vcmp.lt.u32.totalorder %v32_v13, 2147483648 }
  0x13   :  { %v35_v14 = vsel %vm33_vm0, %v34_v12, 0.0 }
  0x14   :  { %39 = vperm.xlu0 %71, %v35_v14  }
  0x8f   :  { %v40_v16 = vpop.permute.xlu0 %39 }
  0x90   :  { %v42_v17 = vmul.f32 %v40_v16, %v36_v15 }
  0x92   :  { %v44_v18 = vsel %vm43_vm1, %v42_v17, 0.0 }
  0x93   :  { %v45_v19 = vrot.slane %v44_v18, 4 }
  0x95   :  { %v46_v20 = vadd.f32 %v45_v19, %v44_v18 }
  0x97   :  { %v47_v21 = vrot.slane %v46_v20, 2 }
  0x99   :  { %v48_v22 = vadd.f32 %v47_v21, %v46_v20 }
  0x9b   :  { %v49_v23 = vrot.slane %v48_v22, 1 }
  0x9d   :  { %v50_v25 = vadd.f32 %v49_v23, %v48_v22 }
  0x9f   :  { %v52_v26 = vadd.f32 %v51_v24, %v50_v25 }
  0xa1   :  { %54 = vst.msk [vmem:[#allocation3] sm:$0x1] %vm53_vm2, %v52_v26 }
  0xa2   :  { %83 = shalt.err (!%p80_p4)
}
  0xa3   :  { %64 = dma.vmem_to_hbm [thread:$0]  %s62_s23, 16, %s140_s4, [#allocation4]  }
  0xa4   :  { %92 = dma.done.wait [#allocation4], 16  }
  0xa5   :  { %93 = vsyncadd [#allocation4], 4294967280 }
  0xa6   :  { %68 = vsyncpa [#allocation4], 1 }

</bundles_post_ra>
